<compile_context>
chip_gen: v7x
topology: tpu7x:2x2x1
jax: 0.10.0
libtpu: 0.0.40
codegen_flags: <defaults>
</compile_context>

<pallas_src>
import functools

import jax
import jax.numpy as jnp
import numpy as np
from jax.experimental import pallas as pl
from jax.experimental.pallas import tpu as pltpu

BN_EPS = 1e-5


# --------------------------------------------------------------------------
# One-time probe of pltpu.roll's shift convention (robust across versions).
# We need shifted[:, m] = h1[:, m + off]; under jnp.roll semantics that is
# shift = (-off) % M.  The probe picks the correct sign at runtime.
# --------------------------------------------------------------------------
_ROLL_LIKE_JNP = None


def _roll_semantics_like_jnp():
    global _ROLL_LIKE_JNP
    if _ROLL_LIKE_JNP is None:
        def probe(x_ref, o_ref):
            o_ref[...] = pltpu.roll(x_ref[...], 5, 1)

        x = jnp.arange(8 * 256, dtype=jnp.float32).reshape(8, 256)
        got = pl.pallas_call(
            probe, out_shape=jax.ShapeDtypeStruct((8, 256), jnp.float32))(x)
        _ROLL_LIKE_JNP = bool(jnp.allclose(got, jnp.roll(x, 5, axis=1)))
    return _ROLL_LIKE_JNP


# --------------------------------------------------------------------------
# Precomputed boundary-validity masks (one per block per conv2 tap).
# mask[b, t, 0, m] = 1 iff output position m can read tap t in-bounds for
# dilation dilations[b]; it also kills any roll wrap-around contamination.
# --------------------------------------------------------------------------
def _conv2_boundary_masks(dilations, D, H, W):
    M = D * H * W
    dz, hy, wx = np.meshgrid(np.arange(D), np.arange(H), np.arange(W), indexing="ij")
    dz, hy, wx = dz.reshape(-1), hy.reshape(-1), wx.reshape(-1)
    out = np.zeros((len(dilations), 27, 1, M), np.float32)
    for b, d in enumerate(dilations):
        for kd in range(3):
            for kh in range(3):
                for kw in range(3):
                    t = kd * 9 + kh * 3 + kw
                    valid = ((dz + (kd - 1) * d >= 0) & (dz + (kd - 1) * d < D) &
                             (hy + (kh - 1) * d >= 0) & (hy + (kh - 1) * d < H) &
                             (wx + (kw - 1) * d >= 0) & (wx + (kw - 1) * d < W))
                    out[b, t, 0] = valid.astype(np.float32)
    return out


# --------------------------------------------------------------------------
# Fused Process kernel: one grid step = one batch element, all 3 bottlenecks.
# Layout: activations are (C, M) / (P, M) with the 512-point spatial axis in lanes.
# --------------------------------------------------------------------------
def process_kernel(x_ref, masks_ref, w1_ref, b1_ref, w2_ref, b2_ref,
                   w3_ref, b3_ref, o_ref, col_ref, *, dims, dilations,
                   roll_like_jnp_sem):
    D, H, W = dims
    M = D * H * W
    P = w1_ref.shape[1]

    x = x_ref[0]                                             # (C, M) f32, lanes = M
    for b, d in enumerate(dilations):                        # statically unrolled
        # ---- conv1 (1x1x1) + relu : (P, C) @ (C, M) ----
        h1 = jnp.dot(w1_ref[b], x, preferred_element_type=jnp.float32)
        h1 = jnp.maximum(h1 + b1_ref[b], 0.0)                # (P, M)

        # ---- build in-VMEM im2col (27*P, M): lane rolls (XLU) + masks (VPU) ----
        for kd in range(3):
            for kh in range(3):
                for kw in range(3):
                    t = kd * 9 + kh * 3 + kw
                    off = d * ((kd - 1) * H * W + (kh - 1) * W + (kw - 1))
                    if off == 0:
                        shifted = h1                          # center tap, mask==1
                    else:
                        s = (-off) % M if roll_like_jnp_sem else off % M
                        shifted = pltpu.roll(h1, s, 1) * masks_ref[b, t]
                    col_ref[t * P:(t + 1) * P, :] = shifted   # sublane-aligned store

        # ---- conv2 (dilated 3x3x3) as ONE K=27*P MXU matmul + relu ----
        h2 = jnp.dot(w2_ref[b], col_ref[...], preferred_element_type=jnp.float32)
        h2 = jnp.maximum(h2 + b2_ref[b], 0.0)                 # (P, M)

        # ---- conv3 (1x1x1, BN folded) + residual + relu ----
        y = jnp.dot(w3_ref[b], h2, preferred_element_type=jnp.float32)
        x = jnp.maximum(y + b3_ref[b] + x, 0.0)               # (C, M)

    o_ref[0] = x.astype(o_ref.dtype)


# --------------------------------------------------------------------------
# Wrapper: single pallas_call for the full Process.
# --------------------------------------------------------------------------
def process_pallas(x, all_params, dilations):
    # x: (N, C, D, H, W) -- PyTorch-native NCDHW
    N, C, D, H, W = x.shape
    M = D * H * W
    nb = len(dilations)
    P = all_params[0][0].shape[0]

    # Stack per-block parameters; fold inference-mode BN into conv3.
    w1s = jnp.stack([p[0] for p in all_params])                          # (nb, P, C)
    b1s = jnp.stack([p[1] for p in all_params])[:, :, None]              # (nb, P, 1)
    w2ms = jnp.stack([jnp.transpose(p[2], (0, 2, 3, 4, 1)).reshape(P, 27 * P)
                      for p in all_params])                              # (nb, P, 27P)
    b2s = jnp.stack([p[3] for p in all_params])[:, :, None]              # (nb, P, 1)
    w3fs, b3fs = [], []
    for (_, _, _, _, w3, b3, gamma, beta, rmean, rvar) in all_params:
        scale = gamma * jax.lax.rsqrt(rvar + BN_EPS)
        w3fs.append(w3 * scale[:, None])
        b3fs.append(b3 * scale + beta - rmean * scale)
    w3fs = jnp.stack(w3fs)                                               # (nb, C, P)
    b3fs = jnp.stack(b3fs)[:, :, None]                                   # (nb, C, 1)

    masks = jnp.asarray(_conv2_boundary_masks(dilations, D, H, W))       # (nb,27,1,M)

    xr = x.reshape(N, C, M)
    kern = functools.partial(process_kernel, dims=(D, H, W),
                             dilations=tuple(dilations),
                             roll_like_jnp_sem=_roll_semantics_like_jnp())

    out = pl.pallas_call(
        kern,
        out_shape=jax.ShapeDtypeStruct((N, C, M), x.dtype),
        grid_spec=pltpu.PrefetchScalarGridSpec(
            num_scalar_prefetch=0,
            grid=(N,),
            in_specs=[
                pl.BlockSpec((1, C, M), lambda n: (n, 0, 0)),            # x
                pl.BlockSpec((nb, 27, 1, M), lambda n: (0, 0, 0, 0)),    # tap masks
                pl.BlockSpec((nb, P, C), lambda n: (0, 0, 0)),           # w1
                pl.BlockSpec((nb, P, 1), lambda n: (0, 0, 0)),           # b1
                pl.BlockSpec((nb, P, 27 * P), lambda n: (0, 0, 0)),      # w2 (im2col)
                pl.BlockSpec((nb, P, 1), lambda n: (0, 0, 0)),           # b2
                pl.BlockSpec((nb, C, P), lambda n: (0, 0, 0)),           # w3 (BN folded)
                pl.BlockSpec((nb, C, 1), lambda n: (0, 0, 0)),           # b3 (BN folded)
            ],
            out_specs=pl.BlockSpec((1, C, M), lambda n: (n, 0, 0)),
            scratch_shapes=[pltpu.VMEM((27 * P, M), jnp.float32)],       # im2col
        ),
        compiler_params=pltpu.CompilerParams(
            dimension_semantics=("parallel",)),                          # v7x megacore
    )(xr, masks, w1s, b1s, w2ms, b2s, w3fs, b3fs)
    return out.reshape(N, C, D, H, W)


# --------------------------------------------------------------------------
# Parameter init (PyTorch layouts: conv weights are (out, in, ...)).
# --------------------------------------------------------------------------
def init_bottleneck(key, C, P):
    ks = jax.random.split(key, 10)
    w1 = jax.random.normal(ks[0], (P, C), jnp.float32) / np.sqrt(C)
    b1 = 0.01 * jax.random.normal(ks[1], (P,), jnp.float32)
    w2 = jax.random.normal(ks[2], (P, P, 3, 3, 3), jnp.float32) / np.sqrt(27 * P)
    b2 = 0.01 * jax.random.normal(ks[3], (P,), jnp.float32)
    w3 = jax.random.normal(ks[4], (C, P), jnp.float32) / np.sqrt(P)
    b3 = 0.01 * jax.random.normal(ks[5], (C,), jnp.float32)
    gamma = 1.0 + 0.1 * jax.random.normal(ks[6], (C,), jnp.float32)
    beta = 0.05 * jax.random.normal(ks[7], (C,), jnp.float32)
    rmean = 0.1 * jax.random.normal(ks[8], (C,), jnp.float32)
    rvar = 1.0 + 0.3 * jax.random.uniform(ks[9], (C,), jnp.float32)
    return (w1, b1, w2, b2, w3, b3, gamma, beta, rmean, rvar)


# --------------------------------------------------------------------------
# Pure-JAX reference (independent of the kernel path), channels-first NCDHW.
# --------------------------------------------------------------------------
def bottleneck_ref(x, params, d):
    w1, b1, w2, b2, w3, b3, gamma, beta, rmean, rvar = params
    N, C, D, H, W = x.shape
    P = w1.shape[0]
    bc = lambda v: v[None, :, None, None, None]
    h = jnp.maximum(jnp.einsum("pc,ncdhw->npdhw", w1, x) + bc(b1), 0.0)
    hp = jnp.pad(h, ((0, 0), (0, 0), (d, d), (d, d), (d, d)))
    acc = jnp.zeros((N, P, D, H, W), jnp.float32) + bc(b2)
    for kd in range(3):
        for kh in range(3):
            for kw in range(3):
                sl = hp[:, :, kd * d:kd * d + D, kh * d:kh * d + H, kw * d:kw * d + W]
                acc = acc + jnp.einsum("qp,npdhw->nqdhw", w2[:, :, kd, kh, kw], sl)
    h2 = jnp.maximum(acc, 0.0)
    c3 = jnp.einsum("cp,npdhw->ncdhw", w3, h2) + bc(b3)
    bn = (c3 - bc(rmean)) * bc(gamma * jax.lax.rsqrt(rvar + BN_EPS)) + bc(beta)
    return jnp.maximum(bn + x, 0.0)


def process_ref(x, all_params, dilations):
    for params, d in zip(all_params, dilations):
        x = bottleneck_ref(x, params, d)
    return x


# --------------------------------------------------------------------------
if __name__ == "__main__":
    feature, reduction = 32, 4
    dilations = (1, 2, 3)
    planes = feature // reduction
    N, D, H, W = 2, 8, 8, 8

    key = jax.random.PRNGKey(0)
    kx, kp = jax.random.split(key)
    x = jax.random.normal(kx, (N, feature, D, H, W), jnp.float32)   # NCDHW

    pkeys = jax.random.split(kp, len(dilations))
    all_params = [init_bottleneck(k, feature, planes) for k in pkeys]

    _roll_semantics_like_jnp()   # resolve pltpu.roll convention before tracing

    run = jax.jit(functools.partial(process_pallas, dilations=dilations))
    out = jax.block_until_ready(run(x, all_params))

    ref = process_ref(x, all_params, dilations)
    np.testing.assert_allclose(np.asarray(out), np.asarray(ref), rtol=1e-4, atol=1e-4)

    print("KERNEL_OK")
</pallas_src>

<mosaic_0001>
module attributes {stable_mosaic.version = 11 : i64} {
  func.func @probe(%arg0: memref<8x256xf32, #tpu.memory_space<vmem>>, %arg1: memref<8x256xf32, #tpu.memory_space<vmem>>) attributes {dimension_semantics = [], scalar_prefetch = 0 : i64, scratch_operands = 0 : i64, tpu.core_type = #tpu.core_type<tc>} {
    %c0 = arith.constant 0 : index
    %c0_0 = arith.constant 0 : index
    %0 = vector.load %arg0[%c0, %c0_0] : memref<8x256xf32, #tpu.memory_space<vmem>>, vector<8x256xf32>
    %c5_i32 = arith.constant 5 : i32
    %1 = tpu.dynamic_rotate %0 by %c5_i32 dim 1 : vector<8x256xf32>, i32 -> vector<8x256xf32>
    %c0_1 = arith.constant 0 : index
    %c0_2 = arith.constant 0 : index
    %2 = vector.load %arg1[%c0_1, %c0_2] : memref<8x256xf32, #tpu.memory_space<vmem>>, vector<8x256xf32>
    tpu.vector_store %arg1[%c0_1, %c0_2], %1 {strides = array<i32>} : memref<8x256xf32, #tpu.memory_space<vmem>>, vector<8x256xf32>,
    return
  }
}

</mosaic_0001>

<bundles_post_ra>
// kernel: tpu_custom_call.1
= control target key start
LH: loop header
LB: loop body
LE: loop exit
PB: predicated region body
PF: predicated region fallthrough
CT: control target
= control target key end

     0   :  { %6 = vsyncpa [#allocation3], 0  ;;  %s137_s0 = inlined_call_operand.hbm [shape: f32[8,256], index: 0, kind: input, shape index: {}]   ;;  %s138_s1 = inlined_call_operand.hbm [shape: f32[8,256], index: 1, kind: output, shape index: {}]  }
   0x1   :  { %7 = vsyncpa [#allocation4], 0  ;;  %s100_s6 = smov [#allocation2]   ;;  %s52_s10 = scalar_lea.hbm %s137_s0, 256 }
   0x2   :  { %s14_s7 = sshll.u32 %s100_s6, 4  ;;  %p53_p0 = scmp.ne.s32.totalorder %s137_s0, %s52_s10  ;;  %s15_s7 = int_to_ptr.vmem [resolvable:$true] %s14_s7 }
   0x3   :  { %p56_p1 = scmp.lt.u32.totalorder %s52_s10, %s137_s0 }
   0x5   :  { %p58_p2 = pnand %p56_p1, %p53_p0 }
   0x7   :  { %61 = shalt.err (!%p58_p2)
}
   0x8   :  { %s62_s15 = scalar_lea.vmem %s15_s7, 256  ;;  %p67_p4 = scmp.lt.s32.totalorder %s15_s7, %s15_s7 }
   0x9   :  { %p63_p3 = scmp.ne.s32.totalorder %s15_s7, %s62_s15  ;;  %p68_p5 = scmp.lt.s32.totalorder %s62_s15, %s62_s15 }
   0xb   :  { %p69_p6 = por %p68_p5, %p67_p4 }
   0xd   :  { %p70_p7 = pnand %p69_p6, %p63_p3 }
   0xf   :  { %73 = shalt.err (!%p70_p7)
}
  0x10   :  { %17 = dma.hbm_to_vmem [thread:$0]  %s137_s0, 256, %s15_s7, [#allocation3]  }
  0x11   :  { %96 = dma.done.wait [#allocation3], 256  }
  0x12   :  { %97 = vsyncadd [#allocation3], 4294967040  ;;  %v21_v0 = vld [vmem:[#allocation2] sm:$0xff]  ;;  %s101_s18 = smov 5   ;;  %v22_v1 = vld [vmem:[#allocation2 + $0x8] sm:$0xff]  ;;  %v27_v2 = vlaneseq  ;;  %s102_s19 = smov [#allocation5]  }
  0x13   :  { %23 = vrot.lane.b32.xlu0 %v21_v0, %s101_s18  ;;  %s40_s20 = sshll.u32 %s102_s19, 4  ;;  %s41_s20 = int_to_ptr.vmem [resolvable:$true] %s40_s20 }
  0x14   :  { %v28_v3 = vand.u32 127, %v27_v2  ;;  %s74_s0 = scalar_lea.vmem %s41_s20, 256  ;;  %p79_p9 = scmp.lt.s32.totalorder %s41_s20, %s41_s20 }
  0x15   :  { %p75_p8 = scmp.ne.s32.totalorder %s41_s20, %s74_s0  ;;  %p80_p10 = scmp.lt.s32.totalorder %s74_s0, %s74_s0 }
  0x16   :  { %vm29_vm0 = vcmp.lt.s32.totalorder %v28_v3, 5 }
  0x17   :  { %25 = vrot.lane.b32.xlu0 %v22_v1, %s101_s18  ;;  %p81_p11 = por %p80_p10, %p79_p9 }
  0x19   :  { %p82_p12 = pnand %p81_p11, %p75_p8 }
  0x85   :  { %v24_v4 = vpop.permute.xlu0 %23 }
  0x89   :  { %v26_v5 = vpop.permute.xlu0 %25 }
  0x8a   :  { %v30_v6 = vsel %vm29_vm0, %v24_v4, %v26_v5  ;;  %v31_v7 = vsel %vm29_vm0, %v26_v5, %v24_v4 }
  0x8b   :  { %32 = vst [vmem:[#allocation5] sm:$0xff] %v31_v7  ;;  %33 = vst [vmem:[#allocation5 + $0x8] sm:$0xff] %v30_v6 }
  0x8c   :  { %85 = shalt.err (!%p82_p12)
}
  0x8d   :  { %s86_s23 = scalar_lea.hbm %s138_s1, 256 }
  0x8e   :  { %p87_p13 = scmp.ne.s32.totalorder %s138_s1, %s86_s23  ;;  %p90_p0 = scmp.lt.u32.totalorder %s86_s23, %s138_s1 }
  0x90   :  { %p92_p1 = pnand %p90_p0, %p87_p13 }
  0x92   :  { %95 = shalt.err (!%p92_p1)
}
  0x93   :  { %43 = dma.vmem_to_hbm [thread:$0]  %s41_s20, 256, %s138_s1, [#allocation4]  }
  0x94   :  { %98 = dma.done.wait [#allocation4], 256  }
  0x95   :  { %99 = vsyncadd [#allocation4], 4294967040 }
  0x96   :  { %47 = vsyncpa [#allocation3], 1 }
  0x97   :  { %48 = vsyncpa [#allocation4], 1 }

</bundles_post_ra>
